<compile_context>
chip_gen: v5e
topology: v5e:2x2
jax: 0.10.0
libtpu: 0.0.40
codegen_flags: <defaults>
</compile_context>

<pallas_src>
import functools

import jax
import jax.numpy as jnp
from jax.experimental import pallas as pl
from jax.experimental.pallas import tpu as pltpu


def _round_up(x, m):
    return (x + m - 1) // m * m


def _default_max_tile_b():
    """128 on v5e (4x128^2 MXU already saturated at M=128), 256 elsewhere."""
    try:
        kind = jax.devices()[0].device_kind.lower()
    except Exception:
        return 256
    if "v5 lite" in kind or "v5e" in kind:
        return 128
    return 256


def _choose_tile_b(batch, max_tile_b):
    """Adaptive batch tile.

    Multiple of 16 (bf16 sublane pack), capped at max_tile_b.  Moderate
    batches are split into >=2 grid steps so the batch grid can shard across
    v7x's two TensorCores; tiny batches stay a single step (per-step overhead
    ~0.35 us would dominate).
    """
    b16 = _round_up(max(batch, 1), 16)
    if b16 > max_tile_b:
        return max_tile_b
    if b16 >= 64:
        return _round_up((b16 + 1) // 2, 16)
    return b16


# ----------------------------------------------------------------------------
# Pallas kernel: fused MLP autoencoder forward (one batch tile per grid step)
# ----------------------------------------------------------------------------
def _make_autoencoder_kernel(layer_has_act):
    """layer_has_act: tuple[bool] — per Linear layer, folded-BN + ReLU follows."""
    n_layers = len(layer_has_act)
    assert n_layers >= 1, "autoencoder must have at least one Linear layer"

    def kernel(x_ref, w_ref, b_ref, o_ref):
        # x_ref: (TILE_B, Dpad) bf16   — pipelined per grid step
        # w_ref: (L, Dpad, Dpad) bf16  — VMEM-resident, single-buffered
        # b_ref: (L, Dpad) f32         — VMEM-resident, single-buffered
        h = x_ref[...]                                      # bf16 MXU operand
        acc = None
        for l, has_act in enumerate(layer_has_act):
            w = w_ref[l]                                    # static index
            acc = jnp.dot(h, w, preferred_element_type=jnp.float32)
            acc = acc + b_ref[l:l + 1, :]                   # f32 epilogue
            if has_act:
                acc = jnp.maximum(acc, 0.0)                 # ReLU
            if l + 1 < n_layers:
                h = acc.astype(jnp.bfloat16)                # carry bf16
        o_ref[...] = acc.astype(o_ref.dtype)                # bf16 store

    return kernel


# ----------------------------------------------------------------------------
# Parameter construction (mimics PyTorch defaults, eval mode)
# ----------------------------------------------------------------------------
def _init_linear(key, in_dim, out_dim):
    """PyTorch nn.Linear default init: U(-1/sqrt(in), 1/sqrt(in))."""
    kw, kb = jax.random.split(key)
    bound = 1.0 / jnp.sqrt(float(in_dim))
    w = jax.random.uniform(kw, (in_dim, out_dim), jnp.float32, -bound, bound)
    b = jax.random.uniform(kb, (out_dim,), jnp.float32, -bound, bound)
    return w, b


def build_params(key, input_dim, hidden_dims, latent_dim):
    """Returns (raw_params, layer_has_act).

    raw_params: list of (W(in,out), b(out,), bn) with bn = (gamma, beta,
    running_mean, running_var) for Linear+BN+ReLU layers, else None.
    """
    enc_dims = [input_dim] + list(hidden_dims) + [latent_dim]
    dec_dims = [latent_dim] + list(reversed(hidden_dims)) + [input_dim]

    layer_io, has_act = [], []
    for i in range(len(hidden_dims)):                       # encoder hiddens
        layer_io.append((enc_dims[i], enc_dims[i + 1])); has_act.append(True)
    layer_io.append((enc_dims[-2], enc_dims[-1])); has_act.append(False)  # -> latent
    for i in range(len(hidden_dims)):                       # decoder hiddens
        layer_io.append((dec_dims[i], dec_dims[i + 1])); has_act.append(True)
    layer_io.append((dec_dims[-2], dec_dims[-1])); has_act.append(False)  # -> input

    raw = []
    keys = jax.random.split(key, len(layer_io))
    for k, (din, dout), act in zip(keys, layer_io, has_act):
        w, b = _init_linear(k, din, dout)
        if act:
            # Freshly-initialized BatchNorm1d running stats / affine params.
            bn = (jnp.ones((dout,), jnp.float32),    # gamma
                  jnp.zeros((dout,), jnp.float32),   # beta
                  jnp.zeros((dout,), jnp.float32),   # running_mean
                  jnp.ones((dout,), jnp.float32))    # running_var
        else:
            bn = None
        raw.append((w, b, bn))
    return raw, tuple(has_act)


def fold_and_pack(raw_params, eps=1e-5):
    """Fold eval-mode BN into weights/bias and pack into lane-dense slabs.

    Dpad is the next multiple of 128 of the largest layer dim (no padding
    beyond that — wider K/N on v6e/v7x would be pure wasted flops/bytes).
    """
    dims = set()
    for w, _, _ in raw_params:
        dims.add(w.shape[0]); dims.add(w.shape[1])
    d_pad = _round_up(max(dims), 128)
    n_layers = len(raw_params)

    w_slab = jnp.zeros((n_layers, d_pad, d_pad), jnp.bfloat16)
    b_slab = jnp.zeros((n_layers, d_pad), jnp.float32)
    for l, (w, b, bn) in enumerate(raw_params):
        if bn is not None:
            gamma, beta, mean, var = bn
            scale = gamma / jnp.sqrt(var + eps)
            w_f = w * scale[None, :]
            b_f = b * scale + (beta - mean * scale)
        else:
            w_f, b_f = w, b
        din, dout = w.shape
        w_slab = w_slab.at[l, :din, :dout].set(w_f.astype(jnp.bfloat16))
        b_slab = b_slab.at[l, :dout].set(b_f)
    return w_slab, b_slab, d_pad


# ----------------------------------------------------------------------------
# Wrapper
# ----------------------------------------------------------------------------
def autoencoder_forward(x, w_slab, b_slab, layer_has_act, *, max_tile_b=None):
    batch, feat = x.shape
    n_layers, d_pad, _ = w_slab.shape

    if max_tile_b is None:
        max_tile_b = _default_max_tile_b()
    tile_b = _choose_tile_b(batch, max_tile_b)
    b_pad = _round_up(batch, tile_b)
    grid = (b_pad // tile_b,)

    # Minimal zero-pad of the bf16 cast (no zeros+scatter HBM round trip;
    # no-op when shapes already match the padded layout).
    x_p = x.astype(jnp.bfloat16)
    if b_pad != batch or d_pad != feat:
        x_p = jnp.pad(x_p, ((0, b_pad - batch), (0, d_pad - feat)))

    flops = 2 * b_pad * n_layers * d_pad * d_pad
    bytes_accessed = (w_slab.size * 2 + b_slab.size * 4     # params
                      + b_pad * d_pad * 2                   # x   (bf16)
                      + b_pad * d_pad * 2)                  # out (bf16)

    # VMEM budget: single-buffered param slabs + double-buffered x/out tiles
    # + f32 activation headroom.  Explicit so large hidden dims stay viable on
    # v7x (64 MiB physical, 32 MiB default scoped).
    w_bytes = n_layers * d_pad * d_pad * 2
    b_bytes = n_layers * d_pad * 4
    io_bytes = 2 * 2 * tile_b * d_pad * 2
    act_bytes = 4 * tile_b * d_pad * 4
    vmem_limit = int(min(64 << 20,
                         max(32 << 20,
                             2 * (w_bytes + b_bytes + io_bytes + act_bytes))))

    out_p = pl.pallas_call(
        _make_autoencoder_kernel(layer_has_act),
        out_shape=jax.ShapeDtypeStruct((b_pad, d_pad), jnp.bfloat16),
        grid=grid,
        in_specs=[
            # x: batch-tiled, software-pipelined.
            pl.BlockSpec((tile_b, d_pad), lambda i: (i, 0)),
            # Weight / bias slabs: VMEM-resident (constant index_map),
            # single-buffered so they are not needlessly double-buffered.
            pl.BlockSpec((n_layers, d_pad, d_pad), lambda i: (0, 0, 0),
                         pipeline_mode=pl.Buffered(1)),
            pl.BlockSpec((n_layers, d_pad), lambda i: (0, 0),
                         pipeline_mode=pl.Buffered(1)),
        ],
        out_specs=pl.BlockSpec((tile_b, d_pad), lambda i: (i, 0)),
        compiler_params=pltpu.CompilerParams(
            dimension_semantics=("parallel",),
            vmem_limit_bytes=vmem_limit),
        cost_estimate=pl.CostEstimate(
            flops=flops, transcendentals=0, bytes_accessed=bytes_accessed),
    )(x_p, w_slab, b_slab)

    # Drop padding; upcast for downstream consumers that expect f32.
    return out_p[:batch, :feat].astype(jnp.float32)


# ----------------------------------------------------------------------------
# Pure-JAX reference (unfolded eval-mode math, mirrors the PyTorch module)
# ----------------------------------------------------------------------------
def reference_forward(x, raw_params, layer_has_act, eps=1e-5):
    h = x.astype(jnp.float32)
    for (w, b, bn), act in zip(raw_params, layer_has_act):
        h = h @ w + b
        if act:
            gamma, beta, mean, var = bn
            h = (h - mean) / jnp.sqrt(var + eps) * gamma + beta
            h = jnp.maximum(h, 0.0)
    return h


# ----------------------------------------------------------------------------
if __name__ == "__main__":
    # Small shapes consistent with the module: feature-vector autoencoder.
    batch = 8
    input_dim = 32
    hidden_dims = [64, 32]
    latent_dim = 16

    key = jax.random.PRNGKey(0)
    k_x, k_p = jax.random.split(key)

    x = jax.random.normal(k_x, (batch, input_dim), dtype=jnp.float32)
    raw_params, has_act = build_params(k_p, input_dim, hidden_dims, latent_dim)
    w_slab, b_slab, _ = fold_and_pack(raw_params)

    fwd = jax.jit(functools.partial(autoencoder_forward, layer_has_act=has_act))
    out = fwd(x, w_slab, b_slab)
    out = jax.block_until_ready(out)

    ref = reference_forward(x, raw_params, has_act)
    assert out.shape == (batch, input_dim), out.shape
    # bf16 matmul operands + bf16 output + folded BN -> loose tolerance vs f32.
    assert jnp.allclose(out, ref, rtol=1e-1, atol=5e-2), (
        float(jnp.max(jnp.abs(out - ref))))

    print("KERNEL_OK")
</pallas_src>

<mosaic_0001>
module attributes {stable_mosaic.version = 11 : i64} {
  func.func @kernel(%arg0: i32, %arg1: memref<16x128xbf16, #tpu.memory_space<vmem>>, %arg2: memref<6x128x128xbf16, #tpu.memory_space<vmem>>, %arg3: memref<6x128xf32, #tpu.memory_space<vmem>>, %arg4: memref<16x128xbf16, #tpu.memory_space<vmem>>) attributes {dimension_semantics = [#tpu.dimension_semantics<parallel>], iteration_bounds = array<i64: 1>, scalar_prefetch = 0 : i64, scratch_operands = 0 : i64, tpu.core_type = #tpu.core_type<tc>, window_params = [{transform_indices = @transform_0, window_bounds = array<i64: 16, 128>}, {pipeline_mode = #tpu.pipeline_mode<synchronous>, transform_indices = @transform_1, window_bounds = array<i64: 6, 128, 128>}, {pipeline_mode = #tpu.pipeline_mode<synchronous>, transform_indices = @transform_2, window_bounds = array<i64: 6, 128>}, {transform_indices = @transform_3, window_bounds = array<i64: 16, 128>}]} {
    %c0 = arith.constant 0 : index
    %c0_0 = arith.constant 0 : index
    %0 = vector.load %arg1[%c0, %c0_0] : memref<16x128xbf16, #tpu.memory_space<vmem>>, vector<16x128xbf16>
    %c0_1 = arith.constant 0 : index
    %c0_2 = arith.constant 0 : index
    %c0_3 = arith.constant 0 : index
    %1 = vector.load %arg2[%c0_1, %c0_2, %c0_3] : memref<6x128x128xbf16, #tpu.memory_space<vmem>>, vector<1x128x128xbf16>
    %2 = vector.shape_cast %1 : vector<1x128x128xbf16> to vector<128x128xbf16>
    %cst = arith.constant dense<0.000000e+00> : vector<16x128xf32>
    %3 = tpu.matmul %0, %2, %cst {dimension_numbers = #tpu.dot_dimension_numbers<[1], [0], [0], [1], [0, 0, 1, 1], [], []>} : vector<16x128xbf16>, vector<128x128xbf16>, vector<16x128xf32> -> vector<16x128xf32>
    %c0_4 = arith.constant 0 : index
    %c0_5 = arith.constant 0 : index
    %4 = vector.load %arg3[%c0_4, %c0_5] : memref<6x128xf32, #tpu.memory_space<vmem>>, vector<1x128xf32>
    %5 = vector.broadcast %4 : vector<1x128xf32> to vector<16x128xf32>
    %6 = arith.addf %3, %5 : vector<16x128xf32>
    %cst_6 = arith.constant 0.000000e+00 : f32
    %7 = vector.broadcast %cst_6 : f32 to vector<16x128xf32>
    %8 = arith.maximumf %6, %7 : vector<16x128xf32>
    %9 = arith.truncf %8 : vector<16x128xf32> to vector<16x128xbf16>
    %c1 = arith.constant 1 : index
    %c0_7 = arith.constant 0 : index
    %c0_8 = arith.constant 0 : index
    %10 = vector.load %arg2[%c1, %c0_7, %c0_8] : memref<6x128x128xbf16, #tpu.memory_space<vmem>>, vector<1x128x128xbf16>
    %11 = vector.shape_cast %10 : vector<1x128x128xbf16> to vector<128x128xbf16>
    %cst_9 = arith.constant dense<0.000000e+00> : vector<16x128xf32>
    %12 = tpu.matmul %9, %11, %cst_9 {dimension_numbers = #tpu.dot_dimension_numbers<[1], [0], [0], [1], [0, 0, 1, 1], [], []>} : vector<16x128xbf16>, vector<128x128xbf16>, vector<16x128xf32> -> vector<16x128xf32>
    %c1_10 = arith.constant 1 : index
    %c0_11 = arith.constant 0 : index
    %13 = vector.load %arg3[%c1_10, %c0_11] : memref<6x128xf32, #tpu.memory_space<vmem>>, vector<1x128xf32>
    %14 = vector.broadcast %13 : vector<1x128xf32> to vector<16x128xf32>
    %15 = arith.addf %12, %14 : vector<16x128xf32>
    %cst_12 = arith.constant 0.000000e+00 : f32
    %16 = vector.broadcast %cst_12 : f32 to vector<16x128xf32>
    %17 = arith.maximumf %15, %16 : vector<16x128xf32>
    %18 = arith.truncf %17 : vector<16x128xf32> to vector<16x128xbf16>
    %c2 = arith.constant 2 : index
    %c0_13 = arith.constant 0 : index
    %c0_14 = arith.constant 0 : index
    %19 = vector.load %arg2[%c2, %c0_13, %c0_14] : memref<6x128x128xbf16, #tpu.memory_space<vmem>>, vector<1x128x128xbf16>
    %20 = vector.shape_cast %19 : vector<1x128x128xbf16> to vector<128x128xbf16>
    %cst_15 = arith.constant dense<0.000000e+00> : vector<16x128xf32>
    %21 = tpu.matmul %18, %20, %cst_15 {dimension_numbers = #tpu.dot_dimension_numbers<[1], [0], [0], [1], [0, 0, 1, 1], [], []>} : vector<16x128xbf16>, vector<128x128xbf16>, vector<16x128xf32> -> vector<16x128xf32>
    %c2_16 = arith.constant 2 : index
    %c0_17 = arith.constant 0 : index
    %22 = vector.load %arg3[%c2_16, %c0_17] : memref<6x128xf32, #tpu.memory_space<vmem>>, vector<1x128xf32>
    %23 = vector.broadcast %22 : vector<1x128xf32> to vector<16x128xf32>
    %24 = arith.addf %21, %23 : vector<16x128xf32>
    %25 = arith.truncf %24 : vector<16x128xf32> to vector<16x128xbf16>
    %c3 = arith.constant 3 : index
    %c0_18 = arith.constant 0 : index
    %c0_19 = arith.constant 0 : index
    %26 = vector.load %arg2[%c3, %c0_18, %c0_19] : memref<6x128x128xbf16, #tpu.memory_space<vmem>>, vector<1x128x128xbf16>
    %27 = vector.shape_cast %26 : vector<1x128x128xbf16> to vector<128x128xbf16>
    %cst_20 = arith.constant dense<0.000000e+00> : vector<16x128xf32>
    %28 = tpu.matmul %25, %27, %cst_20 {dimension_numbers = #tpu.dot_dimension_numbers<[1], [0], [0], [1], [0, 0, 1, 1], [], []>} : vector<16x128xbf16>, vector<128x128xbf16>, vector<16x128xf32> -> vector<16x128xf32>
    %c3_21 = arith.constant 3 : index
    %c0_22 = arith.constant 0 : index
    %29 = vector.load %arg3[%c3_21, %c0_22] : memref<6x128xf32, #tpu.memory_space<vmem>>, vector<1x128xf32>
    %30 = vector.broadcast %29 : vector<1x128xf32> to vector<16x128xf32>
    %31 = arith.addf %28, %30 : vector<16x128xf32>
    %cst_23 = arith.constant 0.000000e+00 : f32
    %32 = vector.broadcast %cst_23 : f32 to vector<16x128xf32>
    %33 = arith.maximumf %31, %32 : vector<16x128xf32>
    %34 = arith.truncf %33 : vector<16x128xf32> to vector<16x128xbf16>
    %c4 = arith.constant 4 : index
    %c0_24 = arith.constant 0 : index
    %c0_25 = arith.constant 0 : index
    %35 = vector.load %arg2[%c4, %c0_24, %c0_25] : memref<6x128x128xbf16, #tpu.memory_space<vmem>>, vector<1x128x128xbf16>
    %36 = vector.shape_cast %35 : vector<1x128x128xbf16> to vector<128x128xbf16>
    %cst_26 = arith.constant dense<0.000000e+00> : vector<16x128xf32>
    %37 = tpu.matmul %34, %36, %cst_26 {dimension_numbers = #tpu.dot_dimension_numbers<[1], [0], [0], [1], [0, 0, 1, 1], [], []>} : vector<16x128xbf16>, vector<128x128xbf16>, vector<16x128xf32> -> vector<16x128xf32>
    %c4_27 = arith.constant 4 : index
    %c0_28 = arith.constant 0 : index
    %38 = vector.load %arg3[%c4_27, %c0_28] : memref<6x128xf32, #tpu.memory_space<vmem>>, vector<1x128xf32>
    %39 = vector.broadcast %38 : vector<1x128xf32> to vector<16x128xf32>
    %40 = arith.addf %37, %39 : vector<16x128xf32>
    %cst_29 = arith.constant 0.000000e+00 : f32
    %41 = vector.broadcast %cst_29 : f32 to vector<16x128xf32>
    %42 = arith.maximumf %40, %41 : vector<16x128xf32>
    %43 = arith.truncf %42 : vector<16x128xf32> to vector<16x128xbf16>
    %c5 = arith.constant 5 : index
    %c0_30 = arith.constant 0 : index
    %c0_31 = arith.constant 0 : index
    %44 = vector.load %arg2[%c5, %c0_30, %c0_31] : memref<6x128x128xbf16, #tpu.memory_space<vmem>>, vector<1x128x128xbf16>
    %45 = vector.shape_cast %44 : vector<1x128x128xbf16> to vector<128x128xbf16>
    %cst_32 = arith.constant dense<0.000000e+00> : vector<16x128xf32>
    %46 = tpu.matmul %43, %45, %cst_32 {dimension_numbers = #tpu.dot_dimension_numbers<[1], [0], [0], [1], [0, 0, 1, 1], [], []>} : vector<16x128xbf16>, vector<128x128xbf16>, vector<16x128xf32> -> vector<16x128xf32>
    %c5_33 = arith.constant 5 : index
    %c0_34 = arith.constant 0 : index
    %47 = vector.load %arg3[%c5_33, %c0_34] : memref<6x128xf32, #tpu.memory_space<vmem>>, vector<1x128xf32>
    %48 = vector.broadcast %47 : vector<1x128xf32> to vector<16x128xf32>
    %49 = arith.addf %46, %48 : vector<16x128xf32>
    %50 = arith.truncf %49 : vector<16x128xf32> to vector<16x128xbf16>
    %c0_35 = arith.constant 0 : index
    %c0_36 = arith.constant 0 : index
    %51 = vector.load %arg4[%c0_35, %c0_36] : memref<16x128xbf16, #tpu.memory_space<vmem>>, vector<16x128xbf16>
    tpu.vector_store %arg4[%c0_35, %c0_36], %50 {strides = array<i32>} : memref<16x128xbf16, #tpu.memory_space<vmem>>, vector<16x128xbf16>,
    return
  }
  func.func @transform_0(%arg0: i32) -> (i32, i32) {
    %c0_i32 = arith.constant 0 : i32
    %c0_i32_0 = arith.constant 0 : i32
    return %arg0, %c0_i32 : i32, i32
  }
  func.func @transform_1(%arg0: i32) -> (i32, i32, i32) {
    %c0_i32 = arith.constant 0 : i32
    %c0_i32_0 = arith.constant 0 : i32
    %c0_i32_1 = arith.constant 0 : i32
    %c0_i32_2 = arith.constant 0 : i32
    return %c0_i32, %c0_i32_0, %c0_i32_1 : i32, i32, i32
  }
  func.func @transform_2(%arg0: i32) -> (i32, i32) {
    %c0_i32 = arith.constant 0 : i32
    %c0_i32_0 = arith.constant 0 : i32
    %c0_i32_1 = arith.constant 0 : i32
    return %c0_i32, %c0_i32_0 : i32, i32
  }
  func.func @transform_3(%arg0: i32) -> (i32, i32) {
    %c0_i32 = arith.constant 0 : i32
    %c0_i32_0 = arith.constant 0 : i32
    return %arg0, %c0_i32 : i32, i32
  }
}

</mosaic_0001>

<bundles_post_ra>
// kernel: autoencoder_forward.1
= control target key start
LH: loop header
LB: loop body
LE: loop exit
PB: predicated region body
PF: predicated region fallthrough
CT: control target
= control target key end

     0   :  { %8 = vsyncpa [#allocation3], 0  ;;  %s830_s15 = smov [#allocation2]   ;;  %s831_s17 = smov 64   ;;  %s880_s0 = inlined_call_operand.vmem [shape: bf16[16,128], index: 0, kind: input, shape index: {}]   ;;  %s881_s1 = inlined_call_operand.hbm [shape: bf16[6,128,128], index: 1, kind: input, shape index: {}]   ;;  %s882_s2 = inlined_call_operand.vmem [shape: f32[6,128], index: 2, kind: input, shape index: {}]   ;;  %s883_s3 = inlined_call_operand.vmem [shape: bf16[16,128], index: 3, kind: output, shape index: {}]  }
   0x1   :  { %s15_s14 = sshll.u32 %s881_s1, 4  ;;  %s17_s16 = sshll.u32 %s830_s15, 4  ;;  %s16_s14 = int_to_ptr.hbm [resolvable:$true] %s15_s14  ;;  %s18_s16 = int_to_ptr.vmem [resolvable:$true] %s17_s16 }
   0x2   :  { %s832_s18 = smov 4  }
   0x3   :  { %23 = dma.hbm_to_vmem [thread:$0]  %s16_s14, 6144, %s18_s16, [#allocation3], %s831_s17, %s831_s17, %s832_s18  }
   0x4   :  { %828 = dma.done.wait [#allocation3], 6144  }
   0x5   :  { %829 = vsyncadd [#allocation3], 4294961152  ;;  %v749_v0 = vld [vmem:[#allocation2 + $0x38] sm:$0xff]  ;;  %v748_v1 = vld [vmem:[#allocation2 + $0x30] sm:$0xff] }
   0x6   :  { %104 = vmatpush.bf16.msra.mxu0 %v749_v0  ;;  %v757_v2 = vld [vmem:[#allocation2 + $0x78] sm:$0xff]  ;;  %v756_v3 = vld [vmem:[#allocation2 + $0x70] sm:$0xff]  ;;  %v747_v4 = vld [vmem:[#allocation2 + $0x28] sm:$0xff] }
   0x7   :  { %188 = vmatpush.bf16.msra.mxu1 %v757_v2  ;;  %v755_v5 = vld [vmem:[#allocation2 + $0x68] sm:$0xff]  ;;  %v746_v6 = vld [vmem:[#allocation2 + $0x20] sm:$0xff]  ;;  %v745_v8 = vld [vmem:[#allocation2 + $0x18] sm:$0xff] }
   0x8   :  { %v754_v7 = vld [vmem:[#allocation2 + $0x60] sm:$0xff]  ;;  %v744_v9 = vld [vmem:[#allocation2 + $0x10] sm:$0xff]  ;;  %v743_v10 = vld [vmem:[#allocation2 + $0x8] sm:$0xff] }
   0x9   :  { %v742_v11 = vld [vmem:[#allocation2] sm:$0xff]  ;;  %v753_v13 = vld [vmem:[#allocation2 + $0x58] sm:$0xff]  ;;  %v752_v14 = vld [vmem:[#allocation2 + $0x50] sm:$0xff] }
   0xa   :  { %105 = vmatpush.bf16.msra.mxu0 %v748_v1  ;;  %v741_v12 = vld [vmem:[%s880_s0] sm:$0xff]  ;;  %v751_v15 = vld [vmem:[#allocation2 + $0x48] sm:$0xff]  ;;  %v765_v17 = vld [vmem:[#allocation2 + $0xb8] sm:$0xff] }
   0xb   :  { %189 = vmatpush.bf16.msra.mxu1 %v756_v3  ;;  %v750_v16 = vld [vmem:[#allocation2 + $0x40] sm:$0xff]  ;;  %272 = vmatpush.bf16.msra.mxu2 %v765_v17  ;;  %v764_v18 = vld [vmem:[#allocation2 + $0xb0] sm:$0xff]  ;;  %v763_v19 = vld [vmem:[#allocation2 + $0xa8] sm:$0xff] }
   0xc   :  { %v762_v20 = vld [vmem:[#allocation2 + $0xa0] sm:$0xff]  ;;  %v761_v29 = vld [vmem:[#allocation2 + $0x98] sm:$0xff]  ;;  %v760_v30 = vld [vmem:[#allocation2 + $0x90] sm:$0xff] }
   0xd   :  { %v798_v22 = vld [vmem:[%s882_s2] ss:$0 sm:$0xff]  ;;  %v759_v31 = vld [vmem:[#allocation2 + $0x88] sm:$0xff]  ;;  %v773_v33 = vld [vmem:[#allocation2 + $0xf8] sm:$0xff] }
   0xe   :  { %106 = vmatpush.bf16.msra.mxu0 %v747_v4  ;;  %v758_v32 = vld [vmem:[#allocation2 + $0x80] sm:$0xff]  ;;  %354 = vmatpush.bf16.msra.mxu3 %v773_v33  ;;  %v772_v34 = vld [vmem:[#allocation2 + $0xf0] sm:$0xff]  ;;  %v771_v35 = vld [vmem:[#allocation2 + $0xe8] sm:$0xff] }
   0xf   :  { %190 = vmatpush.bf16.msra.mxu1 %v755_v5  ;;  %273 = vmatpush.bf16.msra.mxu2 %v764_v18  ;;  %v770_v36 = vld [vmem:[#allocation2 + $0xe0] sm:$0xff]  ;;  %v769_v37 = vld [vmem:[#allocation2 + $0xd8] sm:$0xff]  ;;  %v768_v46 = vld [vmem:[#allocation2 + $0xd0] sm:$0xff] }
  0x10   :  { %v799_v39 = vld [vmem:[%s882_s2 + $0x1] ss:$0 sm:$0xff]  ;;  %v767_v47 = vld [vmem:[#allocation2 + $0xc8] sm:$0xff]  ;;  %v781_v49 = vld [vmem:[#allocation2 + $0x138] sm:$0xff] }
  0x11   :  { %v766_v48 = vld [vmem:[#allocation2 + $0xc0] sm:$0xff]  ;;  %v780_v50 = vld [vmem:[#allocation2 + $0x130] sm:$0xff]  ;;  %v779_v51 = vld [vmem:[#allocation2 + $0x128] sm:$0xff] }
  0x12   :  { %107 = vmatpush.bf16.msra.mxu0 %v746_v6  ;;  %355 = vmatpush.bf16.msra.mxu3 %v772_v34  ;;  %v778_v52 = vld [vmem:[#allocation2 + $0x120] sm:$0xff]  ;;  %v777_v59 = vld [vmem:[#allocation2 + $0x118] sm:$0xff]  ;;  %v776_v60 = vld [vmem:[#allocation2 + $0x110] sm:$0xff] }
  0x13   :  { %191 = vmatpush.bf16.msra.mxu1 %v754_v7  ;;  %274 = vmatpush.bf16.msra.mxu2 %v763_v19  ;;  %v800_v54 = vld [vmem:[%s882_s2 + $0x2] ss:$0 sm:$0xff]  ;;  %v775_v61 = vld [vmem:[#allocation2 + $0x108] sm:$0xff]  ;;  %v789_v63 = vld [vmem:[#allocation2 + $0x178] sm:$0xff] }
  0x14   :  { %v774_v62 = vld [vmem:[#allocation2 + $0x100] sm:$0xff]  ;;  %v788_v0 = vld [vmem:[#allocation2 + $0x170] sm:$0xff]  ;;  %v787_v1 = vld [vmem:[#allocation2 + $0x168] sm:$0xff] }
  0x15   :  { %v786_v2 = vld [vmem:[#allocation2 + $0x160] sm:$0xff] }
  0x16   :  { %108 = vmatpush.bf16.msra.mxu0 %v745_v8  ;;  %356 = vmatpush.bf16.msra.mxu3 %v771_v35  ;;  %v801_v4 = vld [vmem:[%s882_s2 + $0x3] ss:$0 sm:$0xff] }
  0x17   :  { %192 = vmatpush.bf16.msra.mxu1 %v753_v13  ;;  %275 = vmatpush.bf16.msra.mxu2 %v762_v20  ;;  %v783_v13 = vld [vmem:[#allocation2 + $0x148] sm:$0xff] }
  0x1a   :  { %109 = vmatpush.bf16.msra.mxu0 %v744_v9  ;;  %357 = vmatpush.bf16.msra.mxu3 %v770_v36 }
  0x1b   :  { %193 = vmatpush.bf16.msra.mxu1 %v752_v14  ;;  %276 = vmatpush.bf16.msra.mxu2 %v761_v29  ;;  %v782_v14 = vld [vmem:[#allocation2 + $0x140] sm:$0xff] }
  0x1e   :  { %110 = vmatpush.bf16.msra.mxu0 %v743_v10  ;;  %358 = vmatpush.bf16.msra.mxu3 %v769_v37 }
  0x1f   :  { %194 = vmatpush.bf16.msra.mxu1 %v751_v15  ;;  %277 = vmatpush.bf16.msra.mxu2 %v760_v30 }
  0x22   :  { %111 = vmatpush.bf16.msra.mxu0 %v742_v11  ;;  %359 = vmatpush.bf16.msra.mxu3 %v768_v46  ;;  %v785_v11 = vld [vmem:[#allocation2 + $0x158] sm:$0xff] }
  0x23   :  { %195 = vmatpush.bf16.msra.mxu1 %v750_v16  ;;  %278 = vmatpush.bf16.msra.mxu2 %v759_v31  ;;  %v802_v16 = vld [vmem:[%s882_s2 + $0x4] ss:$0 sm:$0xff] }
  0x25   :  { %112 = vmatmul.bf16.vlgmr.msra.gmra.mxu0 %v741_v12  ;;  %v784_v12 = vld [vmem:[#allocation2 + $0x150] sm:$0xff] }
  0x26   :  { %360 = vmatpush.bf16.msra.mxu3 %v767_v47  ;;  %438 = vmatpush.bf16.msrb.mxu0 %v781_v49 }
  0x27   :  { %279 = vmatpush.bf16.msra.mxu2 %v758_v32  ;;  %522 = vmatpush.bf16.msrb.mxu1 %v789_v63 }
  0x2a   :  { %361 = vmatpush.bf16.msra.mxu3 %v766_v48  ;;  %439 = vmatpush.bf16.msrb.mxu0 %v780_v50 }
  0x2b   :  { %523 = vmatpush.bf16.msrb.mxu1 %v788_v0 }
  0x2e   :  { %440 = vmatpush.bf16.msrb.mxu0 %v779_v51 }
  0x2f   :  { %524 = vmatpush.bf16.msrb.mxu1 %v787_v1 }
  0x32   :  { %441 = vmatpush.bf16.msrb.mxu0 %v778_v52 }
  0x33   :  { %525 = vmatpush.bf16.msrb.mxu1 %v786_v2 }
  0x36   :  { %442 = vmatpush.bf16.msrb.mxu0 %v777_v59 }
  0x37   :  { %526 = vmatpush.bf16.msrb.mxu1 %v785_v11 }
  0x3a   :  { %443 = vmatpush.bf16.msrb.mxu0 %v776_v60 }
  0x3b   :  { %527 = vmatpush.bf16.msrb.mxu1 %v784_v12 }
  0x3e   :  { %444 = vmatpush.bf16.msrb.mxu0 %v775_v61 }
  0x3f   :  { %528 = vmatpush.bf16.msrb.mxu1 %v783_v13 }
  0x42   :  { %445 = vmatpush.bf16.msrb.mxu0 %v774_v62 }
  0x43   :  { %529 = vmatpush.bf16.msrb.mxu1 %v782_v14 }
  0xa2   :  { %v113_v21 = vpop.f32.mrf.mxu0 }
  0xa3   :  { %v114_v23 = vadd.f32 %v798_v22, %v113_v21 }
  0xa5   :  { %v118_v26 = vmax.f32 %v114_v23, 0.0 }
  0xaa   :  { %v115_v24 = vpop.f32.mrf.mxu0 }
  0xab   :  { %v116_v25 = vadd.f32 %v798_v22, %v115_v24  ;;  %v803_v24 = vld [vmem:[%s882_s2 + $0x5] ss:$0 sm:$0xff] }
  0xad   :  { %v119_v27 = vmax.f32 %v116_v25, 0.0 }
  0xaf   :  { %v120_v28 = vpack.c.bf16 %v119_v27, %v118_v26 }
  0xb1   :  { %196 = vmatmul.bf16.vlgmr.msra.gmra.mxu1 %v120_v28 }
 0x12e   :  { %v197_v38 = vpop.f32.mrf.mxu1 }
 0x12f   :  { %v198_v40 = vadd.f32 %v799_v39, %v197_v38 }
 0x131   :  { %v202_v43 = vmax.f32 %v198_v40, 0.0 }
 0x136   :  { %v199_v41 = vpop.f32.mrf.mxu1 }
 0x137   :  { %v200_v42 = vadd.f32 %v799_v39, %v199_v41 }
 0x139   :  { %v203_v44 = vmax.f32 %v200_v42, 0.0 }
 0x13b   :  { %v204_v45 = vpack.c.bf16 %v203_v44, %v202_v43 }
 0x13d   :  { %280 = vmatmul.bf16.vlgmr.msra.gmra.mxu2 %v204_v45 }
 0x1c0   :  { %v281_v53 = vpop.f32.mrf.mxu2 }
 0x1c1   :  { %v282_v56 = vadd.f32 %v800_v54, %v281_v53 }
 0x1c8   :  { %v283_v55 = vpop.f32.mrf.mxu2 }
 0x1c9   :  { %v284_v57 = vadd.f32 %v800_v54, %v283_v55 }
 0x1cb   :  { %v286_v58 = vpack.c.bf16 %v284_v57, %v282_v56 }
 0x1cd   :  { %362 = vmatmul.bf16.vlgmr.msra.gmra.mxu3 %v286_v58 }
 0x250   :  { %v363_v3 = vpop.f32.mrf.mxu3 }
 0x251   :  { %v364_v5 = vadd.f32 %v801_v4, %v363_v3 }
 0x253   :  { %v368_v8 = vmax.f32 %v364_v5, 0.0 }
 0x258   :  { %v365_v6 = vpop.f32.mrf.mxu3 }
 0x259   :  { %v366_v7 = vadd.f32 %v801_v4, %v365_v6 }
 0x25b   :  { %v369_v9 = vmax.f32 %v366_v7, 0.0 }
 0x25d   :  { %v370_v10 = vpack.c.bf16 %v369_v9, %v368_v8 }
 0x25f   :  { %446 = vmatmul.bf16.vlgmr.msrb.gmra.mxu0 %v370_v10 }
 0x2dc   :  { %v447_v15 = vpop.f32.mrf.mxu0 }
 0x2dd   :  { %v448_v17 = vadd.f32 %v802_v16, %v447_v15 }
 0x2df   :  { %v452_v20 = vmax.f32 %v448_v17, 0.0 }
 0x2e4   :  { %v449_v18 = vpop.f32.mrf.mxu0 }
 0x2e5   :  { %v450_v19 = vadd.f32 %v802_v16, %v449_v18 }
 0x2e7   :  { %v453_v21 = vmax.f32 %v450_v19, 0.0 }
 0x2e9   :  { %v454_v22 = vpack.c.bf16 %v453_v21, %v452_v20 }
 0x2eb   :  { %530 = vmatmul.bf16.vlgmr.msrb.gmra.mxu1 %v454_v22 }
 0x368   :  { %v531_v23 = vpop.f32.mrf.mxu1 }
 0x369   :  { %v532_v26 = vadd.f32 %v803_v24, %v531_v23 }
 0x370   :  { %v533_v25 = vpop.f32.mrf.mxu1 }
 0x371   :  { %v534_v27 = vadd.f32 %v803_v24, %v533_v25 }
 0x373   :  { %v793_v28 = vpack.c.bf16 %v534_v27, %v532_v26 }
 0x375   :  { %794 = vst [vmem:[%s883_s3] sm:$0xff] %v793_v28  }
 0x376   :  { %544 = vsyncpa [#allocation3], 1 }

</bundles_post_ra>
